<compile_context>
chip_gen: v7x
topology: tpu7x:2x2x1
jax: 0.10.0
libtpu: 0.0.40
codegen_flags: <defaults>
</compile_context>

<pallas_src>
import functools

import jax
import jax.numpy as jnp
import numpy as np
from jax import lax
from jax.experimental import pallas as pl
from jax.experimental.pallas import tpu as pltpu


def _round_up(x, m):
    return -(-x // m) * m


def _vmem_capacity_bytes():
    """Physical VMEM per TensorCore; conservative fallback if the query fails."""
    try:
        info = pltpu.get_tpu_info()
        for name in ("vmem_capacity_bytes", "vmem_size_bytes", "vmem_bytes"):
            cap = getattr(info, name, None)
            if cap:
                return int(cap)
    except Exception:
        pass
    return 64 * 1024 * 1024  # v7x per-TC VMEM — safe on every chip.


def _cdhol_kernel(pm_ref, ph_ref, tm_ref, th_ref, out_ref, *,
                  order, c, total, tile_rows, seam_rows, halo_rows):
    """One tile of the lane-packed (rows, 128) flat layout.

    pm/tm : (tile_rows, 128) main blocks of pred/target (native dtype).
    ph/th : (halo_rows, 128) head of the *next* tile (seam dependencies).
    out   : (1, order, 8, 128) per-tile, per-order partial sums of squares.
    """
    dl = c % 128          # lane part of the flat shift by `c`
    dr = c // 128         # row  part of the flat shift by `c`

    t = pl.program_id(0)
    f0 = t * (tile_rows * 128)              # first flat element of this tile
    n_int_rows = tile_rows - seam_rows      # rows handled without the halo

    out_ref[...] = jnp.zeros_like(out_ref)  # this tile's partial-sum block

    # Linearity: diff^k(pred) - diff^k(target) == diff^k(pred - target).
    # Cast to f32 in-kernel (inputs stream from HBM in their native dtype).
    d_main = pm_ref[...].astype(jnp.float32) - tm_ref[...].astype(jnp.float32)
    d_halo = ph_ref[...].astype(jnp.float32) - th_ref[...].astype(jnp.float32)
    # Small seam slab = tail of this tile + head of the next (no full-tile concat).
    d_seam = jnp.concatenate([d_main[n_int_rows:, :], d_halo], axis=0)

    def lane_hi_mask(shape):
        if dl == 0:
            return None
        return lax.broadcasted_iota(jnp.int32, shape, 1) >= (128 - dl)

    def shift_c(x, lane_hi):
        """View x as a flat row-major buffer and shift it by `c` positions.

        The bottom rows of the result wrap around (garbage); callers never sum
        them (they are covered by the seam slab / masked out).
        """
        rows = x.shape[0]
        if dl:
            x = pltpu.roll(x, shift=128 - dl, axis=1)        # lane shift (XLU)
        a = pltpu.roll(x, shift=rows - dr, axis=0) if dr else x
        if dl:
            b = pltpu.roll(x, shift=rows - dr - 1, axis=0)    # next-row carry
            return jnp.where(lane_hi, b, a)
        return a

    # ---- interior rows [0, n_int_rows): no halo needed ----------------------
    if n_int_rows > 0:
        lane_hi = lane_hi_mask(d_main.shape)
        n_chunks = n_int_rows // 8
        # Fast path: every interior element is valid at the highest order.
        is_interior = (f0 + n_int_rows * 128 + order * c) <= total

        @pl.when(is_interior)
        def _fast():
            d = d_main
            for lvl in range(order):
                d = shift_c(d, lane_hi) - d
                di = d[:n_int_rows]
                out_ref[0, lvl] += jnp.sum(
                    (di * di).reshape(n_chunks, 8, 128), axis=0)

        @pl.when(jnp.logical_not(is_interior))
        def _masked():
            gf = (f0
                  + lax.broadcasted_iota(jnp.int32, (n_int_rows, 128), 0) * 128
                  + lax.broadcasted_iota(jnp.int32, (n_int_rows, 128), 1))
            d = d_main
            for lvl in range(order):
                d = shift_c(d, lane_hi) - d
                di = d[:n_int_rows]
                sq = jnp.where(gf < (total - (lvl + 1) * c), di * di, 0.0)
                out_ref[0, lvl] += jnp.sum(sq.reshape(n_chunks, 8, 128), axis=0)

    # ---- seam rows [n_int_rows, tile_rows): small, always masked -------------
    slab_rows = seam_rows + halo_rows
    lane_hi_s = lane_hi_mask(d_seam.shape)
    row_s = lax.broadcasted_iota(jnp.int32, d_seam.shape, 0)
    gf_s = (f0 + n_int_rows * 128 + row_s * 128
            + lax.broadcasted_iota(jnp.int32, d_seam.shape, 1))
    ds = d_seam
    for lvl in range(order):
        ds = shift_c(ds, lane_hi_s) - ds
        valid = (row_s < seam_rows) & (gf_s < (total - (lvl + 1) * c))
        sq = jnp.where(valid, ds * ds, 0.0)
        out_ref[0, lvl] += jnp.sum(sq.reshape(slab_rows // 8, 8, 128), axis=0)


def consecutive_difference_higher_order_loss_batch(
    prediction, target, consecutive_size, order=1, _max_tile_rows=None
):
    """JAX wrapper: reshape glue + tiny epilogue; streaming/reduction in Pallas."""
    c = int(consecutive_size)
    order = int(order)
    assert order >= 1
    total = int(np.prod(prediction.shape))
    assert total % c == 0, "numel must be divisible by consecutive_size"
    n_rows = total // c
    assert n_rows > order, "need more than `order` rows after reshape"

    # Lane-dense packing: the whole problem lives on the flat buffer, viewed as
    # (m_rows, 128) so every vreg lane / vld / vst is useful even for tiny C.
    flat_p = prediction.reshape(-1)
    flat_t = target.reshape(-1)
    t_pad = _round_up(total, 128)
    if t_pad != total:
        # TODO(synk): this pad copies the inputs once (only when numel % 128 != 0).
        flat_p = jnp.pad(flat_p, (0, t_pad - total))
        flat_t = jnp.pad(flat_t, (0, t_pad - total))
    m_rows = t_pad // 128
    p2 = flat_p.reshape(m_rows, 128)
    t2 = flat_t.reshape(m_rows, 128)

    # Sub-32-bit dtypes pack along sublanes -> sublane granule 8/16/32.
    min_item = min(p2.dtype.itemsize, t2.dtype.itemsize)
    gran = max(8, 32 // min_item)

    dl, dr = c % 128, c // 128
    adv = dr + (1 if dl else 0)            # wrap-contaminated rows per shift
    bad = max(1, order * adv)
    halo_rows = _round_up(bad, gran)       # next-tile rows DMA'd for the seam
    seam_rows = _round_up(bad, 8)          # tile tail handled via the seam slab

    # VMEM-aware tile sizing: count lane-padded bytes, not raw HBM bytes.
    #   inputs: 2 arrays x 2 pipeline buffers; plus ~6 f32 tile-sized temporaries.
    vmem_cap = _vmem_capacity_bytes()
    vmem_limit = max(32 * 1024 * 1024, min((vmem_cap * 3) // 4, 96 * 1024 * 1024))
    budget = vmem_limit // 2
    in_bytes_row = 2 * 128 * (p2.dtype.itemsize + t2.dtype.itemsize)
    f32_bytes_row = 6 * 128 * 4
    tile_rows = budget // (in_bytes_row + f32_bytes_row)
    if _max_tile_rows is not None:
        tile_rows = min(tile_rows, int(_max_tile_rows))
    tile_rows = min(tile_rows, _round_up(m_rows, halo_rows))
    tile_rows = max(halo_rows, (tile_rows // halo_rows) * halo_rows)

    num_tiles = -(-m_rows // tile_rows)
    h_stride = tile_rows // halo_rows
    n_halo_blocks = -(-m_rows // halo_rows)

    def main_map(i):
        return (i, 0)

    def halo_map(i):
        # First halo_rows of the next tile; clamped at the array end (the data
        # read there is never used by a valid (unmasked) output element).
        return (jnp.minimum((i + 1) * h_stride, n_halo_blocks - 1), 0)

    kernel = functools.partial(
        _cdhol_kernel, order=order, c=c, total=total,
        tile_rows=tile_rows, seam_rows=seam_rows, halo_rows=halo_rows)

    partials = pl.pallas_call(
        kernel,
        out_shape=jax.ShapeDtypeStruct((num_tiles, order, 8, 128), jnp.float32),
        grid=(num_tiles,),
        in_specs=[
            pl.BlockSpec((tile_rows, 128), main_map),   # pred main
            pl.BlockSpec((halo_rows, 128), halo_map),   # pred halo (next tile head)
            pl.BlockSpec((tile_rows, 128), main_map),   # target main
            pl.BlockSpec((halo_rows, 128), halo_map),   # target halo
        ],
        out_specs=pl.BlockSpec((1, order, 8, 128), lambda i: (i, 0, 0, 0)),
        compiler_params=pltpu.CompilerParams(
            dimension_semantics=("parallel",),          # both v7x TCs stream tiles
            vmem_limit_bytes=int(vmem_limit),
        ),
    )(p2, p2, t2, t2)

    # Tiny epilogue: per-order normalization (mean over (N-i)*C, then /order).
    level_sums = jnp.sum(partials, axis=(0, 2, 3))      # (order,)
    weights = jnp.asarray(
        [1.0 / (float(n_rows - i) * float(c) * float(order))
         for i in range(1, order + 1)],
        dtype=jnp.float32)
    return jnp.sum(level_sums * weights).reshape(1)     # (1,), float32


def _reference_jax(prediction, target, consecutive_size, order=1):
    """Pure-JAX reference mirroring the PyTorch loop exactly."""
    p = prediction.reshape(-1, consecutive_size).astype(jnp.float32)
    t = target.reshape(-1, consecutive_size).astype(jnp.float32)
    result = jnp.zeros((1,), jnp.float32)
    pa, pb = p[1:, :], p[:-1, :]
    ta, tb = t[1:, :], t[:-1, :]
    for _ in range(order):
        pd = pa - pb
        td = ta - tb
        result = result + jnp.mean((pd - td) ** 2) / order
        pa, pb = pd[1:, :], pd[:-1, :]
        ta, tb = td[1:, :], td[:-1, :]
    return result


if __name__ == "__main__":
    consecutive_size = 16
    order = 2

    k1, k2, k3, k4 = jax.random.split(jax.random.PRNGKey(0), 4)

    # prediction/target: (batch=2, channels=4, 16, 16) -> flattens to (128, 16)
    prediction = jax.random.normal(k1, (2, 4, 16, 16), dtype=jnp.float32)
    target = jax.random.normal(k2, (2, 4, 16, 16), dtype=jnp.float32)

    loss = consecutive_difference_higher_order_loss_batch(
        prediction, target, consecutive_size, order)
    loss = jax.block_until_ready(loss)
    ref = _reference_jax(prediction, target, consecutive_size, order)
    assert loss.shape == (1,) and loss.dtype == jnp.float32
    np.testing.assert_allclose(np.asarray(loss), np.asarray(ref), rtol=1e-5, atol=1e-6)

    # Second check: force small tiles to exercise multi-tile, real+clamped halo,
    # and the masked (ragged last tile) paths.
    prediction2 = jax.random.normal(k3, (5, 4, 16, 16), dtype=jnp.float32)
    target2 = jax.random.normal(k4, (5, 4, 16, 16), dtype=jnp.float32)
    loss2 = consecutive_difference_higher_order_loss_batch(
        prediction2, target2, consecutive_size, order, _max_tile_rows=32)
    loss2 = jax.block_until_ready(loss2)
    ref2 = _reference_jax(prediction2, target2, consecutive_size, order)
    np.testing.assert_allclose(np.asarray(loss2), np.asarray(ref2), rtol=1e-5, atol=1e-6)

    print("KERNEL_OK")
</pallas_src>

<mosaic_0001>
module attributes {stable_mosaic.version = 11 : i64} {
  func.func @_cdhol_kernel(%arg0: i32, %arg1: memref<16x128xf32, #tpu.memory_space<vmem>>, %arg2: memref<8x128xf32, #tpu.memory_space<vmem>>, %arg3: memref<16x128xf32, #tpu.memory_space<vmem>>, %arg4: memref<8x128xf32, #tpu.memory_space<vmem>>, %arg5: memref<1x2x8x128xf32, #tpu.memory_space<vmem>>) attributes {dimension_semantics = [#tpu.dimension_semantics<parallel>], iteration_bounds = array<i64: 1>, scalar_prefetch = 0 : i64, scratch_operands = 0 : i64, tpu.core_type = #tpu.core_type<tc>, window_params = [{transform_indices = @transform_0, window_bounds = array<i64: 16, 128>}, {transform_indices = @transform_1, window_bounds = array<i64: 8, 128>}, {transform_indices = @transform_2, window_bounds = array<i64: 16, 128>}, {transform_indices = @transform_3, window_bounds = array<i64: 8, 128>}, {transform_indices = @transform_4, window_bounds = array<i64: 1, 2, 8, 128>}]} {
    %c2048_i32 = arith.constant 2048 : i32
    %0 = arith.muli %arg0, %c2048_i32 : i32
    %cst = arith.constant 0.000000e+00 : f32
    %1 = vector.broadcast %cst : f32 to vector<1x2x8x128xf32>
    %c0 = arith.constant 0 : index
    %c0_0 = arith.constant 0 : index
    %c0_1 = arith.constant 0 : index
    %c0_2 = arith.constant 0 : index
    %2 = vector.load %arg5[%c0, %c0_0, %c0_1, %c0_2] : memref<1x2x8x128xf32, #tpu.memory_space<vmem>>, vector<1x2x8x128xf32>
    tpu.vector_store %arg5[%c0, %c0_0, %c0_1, %c0_2], %1 {strides = array<i32>} : memref<1x2x8x128xf32, #tpu.memory_space<vmem>>, vector<1x2x8x128xf32>,
    %c0_3 = arith.constant 0 : index
    %c0_4 = arith.constant 0 : index
    %3 = vector.load %arg1[%c0_3, %c0_4] : memref<16x128xf32, #tpu.memory_space<vmem>>, vector<16x128xf32>
    %c0_5 = arith.constant 0 : index
    %c0_6 = arith.constant 0 : index
    %4 = vector.load %arg3[%c0_5, %c0_6] : memref<16x128xf32, #tpu.memory_space<vmem>>, vector<16x128xf32>
    %5 = arith.subf %3, %4 : vector<16x128xf32>
    %c0_7 = arith.constant 0 : index
    %c0_8 = arith.constant 0 : index
    %6 = vector.load %arg2[%c0_7, %c0_8] : memref<8x128xf32, #tpu.memory_space<vmem>>, vector<8x128xf32>
    %c0_9 = arith.constant 0 : index
    %c0_10 = arith.constant 0 : index
    %7 = vector.load %arg4[%c0_9, %c0_10] : memref<8x128xf32, #tpu.memory_space<vmem>>, vector<8x128xf32>
    %8 = arith.subf %6, %7 : vector<8x128xf32>
    %9 = vector.extract_strided_slice %5 {offsets = [8, 0], sizes = [8, 128], strides = [1, 1]} : vector<16x128xf32> to vector<8x128xf32>
    %10 = tpu.concatenate %9, %8 in 0 : vector<8x128xf32>, vector<8x128xf32> -> vector<16x128xf32>
    %11 = tpu.iota {dimensions = array<i32: 1>} : vector<16x128xi32>
    %c112_i32 = arith.constant 112 : i32
    %12 = vector.broadcast %c112_i32 : i32 to vector<16x128xi32>
    %13 = arith.cmpi sge, %11, %12 : vector<16x128xi32>
    %c1024_i32 = arith.constant 1024 : i32
    %14 = arith.addi %0, %c1024_i32 : i32
    %c32_i32 = arith.constant 32 : i32
    %15 = arith.addi %14, %c32_i32 : i32
    %c2048_i32_11 = arith.constant 2048 : i32
    %16 = arith.cmpi sle, %15, %c2048_i32_11 : i32
    %17 = arith.extui %16 : i1 to i32
    %c0_i32 = arith.constant 0 : i32
    %18 = arith.cmpi ne, %17, %c0_i32 : i32
    scf.if %18 {
      %c112_i32_38 = arith.constant 112 : i32
      %73 = tpu.dynamic_rotate %5 by %c112_i32_38 dim 1 : vector<16x128xf32>, i32 -> vector<16x128xf32>
      %c15_i32_39 = arith.constant 15 : i32
      %74 = tpu.dynamic_rotate %73 by %c15_i32_39 dim 0 : vector<16x128xf32>, i32 -> vector<16x128xf32>
      %75 = arith.select %13, %74, %73 : vector<16x128xi1>, vector<16x128xf32>
      %76 = arith.subf %75, %5 : vector<16x128xf32>
      %77 = vector.extract_strided_slice %76 {offsets = [0, 0], sizes = [8, 128], strides = [1, 1]} : vector<16x128xf32> to vector<8x128xf32>
      %c0_40 = arith.constant 0 : index
      %c0_41 = arith.constant 0 : index
      %c0_42 = arith.constant 0 : index
      %c0_43 = arith.constant 0 : index
      %78 = vector.load %arg5[%c0_40, %c0_41, %c0_42, %c0_43] : memref<1x2x8x128xf32, #tpu.memory_space<vmem>>, vector<1x1x8x128xf32>
      %79 = vector.shape_cast %78 : vector<1x1x8x128xf32> to vector<8x128xf32>
      %80 = arith.mulf %77, %77 : vector<8x128xf32>
      %81 = vector.shape_cast %80 : vector<8x128xf32> to vector<1x8x128xf32>
      %cst_44 = arith.constant dense<0.000000e+00> : vector<8x128xf32>
      %82 = vector.multi_reduction <add>, %81, %cst_44 [0] : vector<1x8x128xf32> to vector<8x128xf32>
      %83 = arith.addf %79, %82 : vector<8x128xf32>
      %c0_45 = arith.constant 0 : index
      %c0_46 = arith.constant 0 : index
      %c0_47 = arith.constant 0 : index
      %c0_48 = arith.constant 0 : index
      %84 = vector.load %arg5[%c0_45, %c0_46, %c0_47, %c0_48] : memref<1x2x8x128xf32, #tpu.memory_space<vmem>>, vector<1x1x8x128xf32>
      %85 = vector.shape_cast %84 : vector<1x1x8x128xf32> to vector<8x128xf32>
      %86 = vector.shape_cast %83 : vector<8x128xf32> to vector<1x1x8x128xf32>
      tpu.vector_store %arg5[%c0_45, %c0_46, %c0_47, %c0_48], %86 {strides = array<i32>} : memref<1x2x8x128xf32, #tpu.memory_space<vmem>>, vector<1x1x8x128xf32>,
      %c112_i32_49 = arith.constant 112 : i32
      %87 = tpu.dynamic_rotate %76 by %c112_i32_49 dim 1 : vector<16x128xf32>, i32 -> vector<16x128xf32>
      %c15_i32_50 = arith.constant 15 : i32
      %88 = tpu.dynamic_rotate %87 by %c15_i32_50 dim 0 : vector<16x128xf32>, i32 -> vector<16x128xf32>
      %89 = arith.select %13, %88, %87 : vector<16x128xi1>, vector<16x128xf32>
      %90 = arith.subf %89, %76 : vector<16x128xf32>
      %91 = vector.extract_strided_slice %90 {offsets = [0, 0], sizes = [8, 128], strides = [1, 1]} : vector<16x128xf32> to vector<8x128xf32>
      %c0_51 = arith.constant 0 : index
      %c1_52 = arith.constant 1 : index
      %c0_53 = arith.constant 0 : index
      %c0_54 = arith.constant 0 : index
      %92 = vector.load %arg5[%c0_51, %c1_52, %c0_53, %c0_54] : memref<1x2x8x128xf32, #tpu.memory_space<vmem>>, vector<1x1x8x128xf32>
      %93 = vector.shape_cast %92 : vector<1x1x8x128xf32> to vector<8x128xf32>
      %94 = arith.mulf %91, %91 : vector<8x128xf32>
      %95 = vector.shape_cast %94 : vector<8x128xf32> to vector<1x8x128xf32>
      %cst_55 = arith.constant dense<0.000000e+00> : vector<8x128xf32>
      %96 = vector.multi_reduction <add>, %95, %cst_55 [0] : vector<1x8x128xf32> to vector<8x128xf32>
      %97 = arith.addf %93, %96 : vector<8x128xf32>
      %c0_56 = arith.constant 0 : index
      %c1_57 = arith.constant 1 : index
      %c0_58 = arith.constant 0 : index
      %c0_59 = arith.constant 0 : index
      %98 = vector.load %arg5[%c0_56, %c1_57, %c0_58, %c0_59] : memref<1x2x8x128xf32, #tpu.memory_space<vmem>>, vector<1x1x8x128xf32>
      %99 = vector.shape_cast %98 : vector<1x1x8x128xf32> to vector<8x128xf32>
      %100 = vector.shape_cast %97 : vector<8x128xf32> to vector<1x1x8x128xf32>
      tpu.vector_store %arg5[%c0_56, %c1_57, %c0_58, %c0_59], %100 {strides = array<i32>} : memref<1x2x8x128xf32, #tpu.memory_space<vmem>>, vector<1x1x8x128xf32>,
    } else {
    }
    %true = arith.constant true
    %19 = arith.xori %16, %true : i1
    %20 = arith.extui %19 : i1 to i32
    %c0_i32_12 = arith.constant 0 : i32
    %21 = arith.cmpi ne, %20, %c0_i32_12 : i32
    scf.if %21 {
      %73 = tpu.iota {dimensions = array<i32: 0>} : vector<8x128xi32>
      %c128_i32_38 = arith.constant 128 : i32
      %74 = vector.broadcast %c128_i32_38 : i32 to vector<8x128xi32>
      %75 = arith.muli %73, %74 : vector<8x128xi32>
      %76 = vector.broadcast %0 : i32 to vector<8x128xi32>
      %77 = arith.addi %76, %75 : vector<8x128xi32>
      %78 = tpu.iota {dimensions = array<i32: 1>} : vector<8x128xi32>
      %79 = arith.addi %77, %78 : vector<8x128xi32>
      %c112_i32_39 = arith.constant 112 : i32
      %80 = tpu.dynamic_rotate %5 by %c112_i32_39 dim 1 : vector<16x128xf32>, i32 -> vector<16x128xf32>
      %c15_i32_40 = arith.constant 15 : i32
      %81 = tpu.dynamic_rotate %80 by %c15_i32_40 dim 0 : vector<16x128xf32>, i32 -> vector<16x128xf32>
      %82 = arith.select %13, %81, %80 : vector<16x128xi1>, vector<16x128xf32>
      %83 = arith.subf %82, %5 : vector<16x128xf32>
      %84 = vector.extract_strided_slice %83 {offsets = [0, 0], sizes = [8, 128], strides = [1, 1]} : vector<16x128xf32> to vector<8x128xf32>
      %c2032_i32_41 = arith.constant 2032 : i32
      %85 = vector.broadcast %c2032_i32_41 : i32 to vector<8x128xi32>
      %86 = arith.cmpi slt, %79, %85 : vector<8x128xi32>
      %87 = arith.mulf %84, %84 : vector<8x128xf32>
      %cst_42 = arith.constant 0.000000e+00 : f32
      %88 = vector.broadcast %cst_42 : f32 to vector<8x128xf32>
      %89 = arith.select %86, %87, %88 : vector<8x128xi1>, vector<8x128xf32>
      %c0_43 = arith.constant 0 : index
      %c0_44 = arith.constant 0 : index
      %c0_45 = arith.constant 0 : index
      %c0_46 = arith.constant 0 : index
      %90 = vector.load %arg5[%c0_43, %c0_44, %c0_45, %c0_46] : memref<1x2x8x128xf32, #tpu.memory_space<vmem>>, vector<1x1x8x128xf32>
      %91 = vector.shape_cast %90 : vector<1x1x8x128xf32> to vector<8x128xf32>
      %92 = vector.shape_cast %89 : vector<8x128xf32> to vector<1x8x128xf32>
      %cst_47 = arith.constant dense<0.000000e+00> : vector<8x128xf32>
      %93 = vector.multi_reduction <add>, %92, %cst_47 [0] : vector<1x8x128xf32> to vector<8x128xf32>
      %94 = arith.addf %91, %93 : vector<8x128xf32>
      %c0_48 = arith.constant 0 : index
      %c0_49 = arith.constant 0 : index
      %c0_50 = arith.constant 0 : index
      %c0_51 = arith.constant 0 : index
      %95 = vector.load %arg5[%c0_48, %c0_49, %c0_50, %c0_51] : memref<1x2x8x128xf32, #tpu.memory_space<vmem>>, vector<1x1x8x128xf32>
      %96 = vector.shape_cast %95 : vector<1x1x8x128xf32> to vector<8x128xf32>
      %97 = vector.shape_cast %94 : vector<8x128xf32> to vector<1x1x8x128xf32>
      tpu.vector_store %arg5[%c0_48, %c0_49, %c0_50, %c0_51], %97 {strides = array<i32>} : memref<1x2x8x128xf32, #tpu.memory_space<vmem>>, vector<1x1x8x128xf32>,
      %c112_i32_52 = arith.constant 112 : i32
      %98 = tpu.dynamic_rotate %83 by %c112_i32_52 dim 1 : vector<16x128xf32>, i32 -> vector<16x128xf32>
      %c15_i32_53 = arith.constant 15 : i32
      %99 = tpu.dynamic_rotate %98 by %c15_i32_53 dim 0 : vector<16x128xf32>, i32 -> vector<16x128xf32>
      %100 = arith.select %13, %99, %98 : vector<16x128xi1>, vector<16x128xf32>
      %101 = arith.subf %100, %83 : vector<16x128xf32>
      %102 = vector.extract_strided_slice %101 {offsets = [0, 0], sizes = [8, 128], strides = [1, 1]} : vector<16x128xf32> to vector<8x128xf32>
      %c2016_i32_54 = arith.constant 2016 : i32
      %103 = vector.broadcast %c2016_i32_54 : i32 to vector<8x128xi32>
      %104 = arith.cmpi slt, %79, %103 : vector<8x128xi32>
      %105 = arith.mulf %102, %102 : vector<8x128xf32>
      %cst_55 = arith.constant 0.000000e+00 : f32
      %106 = vector.broadcast %cst_55 : f32 to vector<8x128xf32>
      %107 = arith.select %104, %105, %106 : vector<8x128xi1>, vector<8x128xf32>
      %c0_56 = arith.constant 0 : index
      %c1_57 = arith.constant 1 : index
      %c0_58 = arith.constant 0 : index
      %c0_59 = arith.constant 0 : index
      %108 = vector.load %arg5[%c0_56, %c1_57, %c0_58, %c0_59] : memref<1x2x8x128xf32, #tpu.memory_space<vmem>>, vector<1x1x8x128xf32>
      %109 = vector.shape_cast %108 : vector<1x1x8x128xf32> to vector<8x128xf32>
      %110 = vector.shape_cast %107 : vector<8x128xf32> to vector<1x8x128xf32>
      %cst_60 = arith.constant dense<0.000000e+00> : vector<8x128xf32>
      %111 = vector.multi_reduction <add>, %110, %cst_60 [0] : vector<1x8x128xf32> to vector<8x128xf32>
      %112 = arith.addf %109, %111 : vector<8x128xf32>
      %c0_61 = arith.constant 0 : index
      %c1_62 = arith.constant 1 : index
      %c0_63 = arith.constant 0 : index
      %c0_64 = arith.constant 0 : index
      %113 = vector.load %arg5[%c0_61, %c1_62, %c0_63, %c0_64] : memref<1x2x8x128xf32, #tpu.memory_space<vmem>>, vector<1x1x8x128xf32>
      %114 = vector.shape_cast %113 : vector<1x1x8x128xf32> to vector<8x128xf32>
      %115 = vector.shape_cast %112 : vector<8x128xf32> to vector<1x1x8x128xf32>
      tpu.vector_store %arg5[%c0_61, %c1_62, %c0_63, %c0_64], %115 {strides = array<i32>} : memref<1x2x8x128xf32, #tpu.memory_space<vmem>>, vector<1x1x8x128xf32>,
    } else {
    }
    %22 = tpu.iota {dimensions = array<i32: 1>} : vector<16x128xi32>
    %c112_i32_13 = arith.constant 112 : i32
    %23 = vector.broadcast %c112_i32_13 : i32 to vector<16x128xi32>
    %24 = arith.cmpi sge, %22, %23 : vector<16x128xi32>
    %25 = tpu.iota {dimensions = array<i32: 0>} : vector<16x128xi32>
    %c1024_i32_14 = arith.constant 1024 : i32
    %26 = arith.addi %0, %c1024_i32_14 : i32
    %c128_i32 = arith.constant 128 : i32
    %27 = vector.broadcast %c128_i32 : i32 to vector<16x128xi32>
    %28 = arith.muli %25, %27 : vector<16x128xi32>
    %29 = vector.broadcast %26 : i32 to vector<16x128xi32>
    %30 = arith.addi %29, %28 : vector<16x128xi32>
    %31 = tpu.iota {dimensions = array<i32: 1>} : vector<16x128xi32>
    %32 = arith.addi %30, %31 : vector<16x128xi32>
    %c112_i32_15 = arith.constant 112 : i32
    %33 = tpu.dynamic_rotate %10 by %c112_i32_15 dim 1 : vector<16x128xf32>, i32 -> vector<16x128xf32>
    %c15_i32 = arith.constant 15 : i32
    %34 = tpu.dynamic_rotate %33 by %c15_i32 dim 0 : vector<16x128xf32>, i32 -> vector<16x128xf32>
    %35 = arith.select %24, %34, %33 : vector<16x128xi1>, vector<16x128xf32>
    %36 = arith.subf %35, %10 : vector<16x128xf32>
    %c8_i32 = arith.constant 8 : i32
    %37 = vector.broadcast %c8_i32 : i32 to vector<16x128xi32>
    %38 = arith.cmpi slt, %25, %37 : vector<16x128xi32>
    %c2032_i32 = arith.constant 2032 : i32
    %39 = vector.broadcast %c2032_i32 : i32 to vector<16x128xi32>
    %40 = arith.cmpi slt, %32, %39 : vector<16x128xi32>
    %41 = arith.andi %38, %40 : vector<16x128xi1>
    %42 = arith.mulf %36, %36 : vector<16x128xf32>
    %cst_16 = arith.constant 0.000000e+00 : f32
    %43 = vector.broadcast %cst_16 : f32 to vector<16x128xf32>
    %44 = arith.select %41, %42, %43 : vector<16x128xi1>, vector<16x128xf32>
    %c0_17 = arith.constant 0 : index
    %c0_18 = arith.constant 0 : index
    %c0_19 = arith.constant 0 : index
    %c0_20 = arith.constant 0 : index
    %45 = vector.load %arg5[%c0_17, %c0_18, %c0_19, %c0_20] : memref<1x2x8x128xf32, #tpu.memory_space<vmem>>, vector<1x1x8x128xf32>
    %46 = vector.shape_cast %45 : vector<1x1x8x128xf32> to vector<8x128xf32>
    %47 = vector.shape_cast %44 : vector<16x128xf32> to vector<2x8x128xf32>
    %cst_21 = arith.constant dense<0.000000e+00> : vector<8x128xf32>
    %48 = vector.multi_reduction <add>, %47, %cst_21 [0] : vector<2x8x128xf32> to vector<8x128xf32>
    %49 = arith.addf %46, %48 : vector<8x128xf32>
    %c0_22 = arith.constant 0 : index
    %c0_23 = arith.constant 0 : index
    %c0_24 = arith.constant 0 : index
    %c0_25 = arith.constant 0 : index
    %50 = vector.load %arg5[%c0_22, %c0_23, %c0_24, %c0_25] : memref<1x2x8x128xf32, #tpu.memory_space<vmem>>, vector<1x1x8x128xf32>
    %51 = vector.shape_cast %50 : vector<1x1x8x128xf32> to vector<8x128xf32>
    %52 = vector.shape_cast %49 : vector<8x128xf32> to vector<1x1x8x128xf32>
    tpu.vector_store %arg5[%c0_22, %c0_23, %c0_24, %c0_25], %52 {strides = array<i32>} : memref<1x2x8x128xf32, #tpu.memory_space<vmem>>, vector<1x1x8x128xf32>,
    %c112_i32_26 = arith.constant 112 : i32
    %53 = tpu.dynamic_rotate %36 by %c112_i32_26 dim 1 : vector<16x128xf32>, i32 -> vector<16x128xf32>
    %c15_i32_27 = arith.constant 15 : i32
    %54 = tpu.dynamic_rotate %53 by %c15_i32_27 dim 0 : vector<16x128xf32>, i32 -> vector<16x128xf32>
    %55 = arith.select %24, %54, %53 : vector<16x128xi1>, vector<16x128xf32>
    %56 = arith.subf %55, %36 : vector<16x128xf32>
    %c8_i32_28 = arith.constant 8 : i32
    %57 = vector.broadcast %c8_i32_28 : i32 to vector<16x128xi32>
    %58 = arith.cmpi slt, %25, %57 : vector<16x128xi32>
    %c2016_i32 = arith.constant 2016 : i32
    %59 = vector.broadcast %c2016_i32 : i32 to vector<16x128xi32>
    %60 = arith.cmpi slt, %32, %59 : vector<16x128xi32>
    %61 = arith.andi %58, %60 : vector<16x128xi1>
    %62 = arith.mulf %56, %56 : vector<16x128xf32>
    %cst_29 = arith.constant 0.000000e+00 : f32
    %63 = vector.broadcast %cst_29 : f32 to vector<16x128xf32>
    %64 = arith.select %61, %62, %63 : vector<16x128xi1>, vector<16x128xf32>
    %c0_30 = arith.constant 0 : index
    %c1 = arith.constant 1 : index
    %c0_31 = arith.constant 0 : index
    %c0_32 = arith.constant 0 : index
    %65 = vector.load %arg5[%c0_30, %c1, %c0_31, %c0_32] : memref<1x2x8x128xf32, #tpu.memory_space<vmem>>, vector<1x1x8x128xf32>
    %66 = vector.shape_cast %65 : vector<1x1x8x128xf32> to vector<8x128xf32>
    %67 = vector.shape_cast %64 : vector<16x128xf32> to vector<2x8x128xf32>
    %cst_33 = arith.constant dense<0.000000e+00> : vector<8x128xf32>
    %68 = vector.multi_reduction <add>, %67, %cst_33 [0] : vector<2x8x128xf32> to vector<8x128xf32>
    %69 = arith.addf %66, %68 : vector<8x128xf32>
    %c0_34 = arith.constant 0 : index
    %c1_35 = arith.constant 1 : index
    %c0_36 = arith.constant 0 : index
    %c0_37 = arith.constant 0 : index
    %70 = vector.load %arg5[%c0_34, %c1_35, %c0_36, %c0_37] : memref<1x2x8x128xf32, #tpu.memory_space<vmem>>, vector<1x1x8x128xf32>
    %71 = vector.shape_cast %70 : vector<1x1x8x128xf32> to vector<8x128xf32>
    %72 = vector.shape_cast %69 : vector<8x128xf32> to vector<1x1x8x128xf32>
    tpu.vector_store %arg5[%c0_34, %c1_35, %c0_36, %c0_37], %72 {strides = array<i32>} : memref<1x2x8x128xf32, #tpu.memory_space<vmem>>, vector<1x1x8x128xf32>,
    return
  }
  func.func @transform_0(%arg0: i32) -> (i32, i32) {
    %c0_i32 = arith.constant 0 : i32
    %c0_i32_0 = arith.constant 0 : i32
    return %arg0, %c0_i32 : i32, i32
  }
  func.func @transform_1(%arg0: i32) -> (i32, i32) {
    %c1_i32 = arith.constant 1 : i32
    %0 = arith.addi %arg0, %c1_i32 : i32
    %c2_i32 = arith.constant 2 : i32
    %1 = arith.muli %0, %c2_i32 : i32
    %c1_i32_0 = arith.constant 1 : i32
    %2 = arith.minsi %1, %c1_i32_0 : i32
    %c0_i32 = arith.constant 0 : i32
    %c0_i32_1 = arith.constant 0 : i32
    return %2, %c0_i32 : i32, i32
  }
  func.func @transform_2(%arg0: i32) -> (i32, i32) {
    %c0_i32 = arith.constant 0 : i32
    %c0_i32_0 = arith.constant 0 : i32
    return %arg0, %c0_i32 : i32, i32
  }
  func.func @transform_3(%arg0: i32) -> (i32, i32) {
    %c1_i32 = arith.constant 1 : i32
    %0 = arith.addi %arg0, %c1_i32 : i32
    %c2_i32 = arith.constant 2 : i32
    %1 = arith.muli %0, %c2_i32 : i32
    %c1_i32_0 = arith.constant 1 : i32
    %2 = arith.minsi %1, %c1_i32_0 : i32
    %c0_i32 = arith.constant 0 : i32
    %c0_i32_1 = arith.constant 0 : i32
    return %2, %c0_i32 : i32, i32
  }
  func.func @transform_4(%arg0: i32) -> (i32, i32, i32, i32) {
    %c0_i32 = arith.constant 0 : i32
    %c0_i32_0 = arith.constant 0 : i32
    %c0_i32_1 = arith.constant 0 : i32
    %c0_i32_2 = arith.constant 0 : i32
    return %arg0, %c0_i32, %c0_i32_0, %c0_i32_1 : i32, i32, i32, i32
  }
}

</mosaic_0001>

<bundles_post_ra>
// kernel: tpu_custom_call.1
= control target key start
LH: loop header
LB: loop body
LE: loop exit
PB: predicated region body
PF: predicated region fallthrough
CT: control target
= control target key end

     0   :  { %9 = vsyncpa [#allocation3], 0  ;;  %s532_s0 = inlined_call_operand.hbm [shape: f32[16,128], index: 0, kind: input, shape index: {}]   ;;  %s533_s1 = inlined_call_operand.hbm [shape: f32[16,128], index: 1, kind: input, shape index: {}]   ;;  %s534_s2 = inlined_call_operand.hbm [shape: f32[16,128], index: 2, kind: input, shape index: {}]   ;;  %s535_s3 = inlined_call_operand.hbm [shape: f32[16,128], index: 3, kind: input, shape index: {}]   ;;  %s536_s4 = inlined_call_operand.hbm [shape: f32[1,2,8,128], index: 4, kind: output, shape index: {}]  }
   0x1   :  { %10 = vsyncpa [#allocation6], 0 }
   0x2   :  { %11 = vsyncpa [#allocation9], 0  ;;  %s35_s17 = scalar_lea.hbm %s533_s1, 128 }
   0x3   :  { %12 = vsyncpa [#allocation4], 0  ;;  %s410_s18 = smov [#allocation5]   ;;  %s411_s20 = smov [#allocation2]  }
   0x4   :  { %s37_s19 = sshll.u32 %s410_s18, 4  ;;  %s18_s21 = sshll.u32 %s411_s20, 4  ;;  %s38_s19 = int_to_ptr.vmem [resolvable:$true] %s37_s19  ;;  %s19_s21 = int_to_ptr.vmem [resolvable:$true] %s18_s21 }
   0x5   :  { %s310_s24 = scalar_lea.hbm %s533_s1, 256  ;;  %p289_p1 = scmp.lt.u32.totalorder %s35_s17, %s533_s1 }
   0x6   :  { %p287_p0 = scmp.ne.s32.totalorder %s35_s17, %s310_s24  ;;  %p290_p2 = scmp.lt.u32.totalorder %s310_s24, %s310_s24 }
   0x7   :  { %p292_p4 = scmp.lt.u32.totalorder %s310_s24, %s35_s17 }
   0x8   :  { %p291_p3 = por %p290_p2, %p289_p1 }
   0xa   :  { %p293_p5 = por %p292_p4, %p291_p3 }
   0xc   :  { %p294_p6 = pnand %p293_p5, %p287_p0 }
   0xe   :  { %297 = shalt.err (!%p294_p6)
}
   0xf   :  { %s298_s27 = scalar_lea.vmem %s38_s19, 128  ;;  %p303_p8 = scmp.lt.s32.totalorder %s38_s19, %s38_s19 }
  0x10   :  { %p299_p7 = scmp.ne.s32.totalorder %s38_s19, %s298_s27  ;;  %p304_p9 = scmp.lt.s32.totalorder %s298_s27, %s298_s27 }
  0x12   :  { %p305_p10 = por %p304_p9, %p303_p8 }
  0x14   :  { %p306_p11 = pnand %p305_p10, %p299_p7 }
  0x16   :  { %309 = shalt.err (!%p306_p11)
}
  0x17   :  { %40 = dma.hbm_to_vmem [thread:$0]  %s35_s17, 128, %s38_s19, [#allocation6]  }
  0x18   :  { %s311_s30 = scalar_lea.hbm %s532_s0, 256 }
  0x19   :  { %p312_p12 = scmp.ne.s32.totalorder %s532_s0, %s311_s30  ;;  %p315_p13 = scmp.lt.u32.totalorder %s311_s30, %s532_s0 }
  0x1b   :  { %p317_p0 = pnand %p315_p13, %p312_p12 }
  0x1d   :  { %320 = shalt.err (!%p317_p0)
}
  0x1e   :  { %s321_s8 = scalar_lea.vmem %s19_s21, 256  ;;  %p326_p2 = scmp.lt.s32.totalorder %s19_s21, %s19_s21 }
  0x1f   :  { %p322_p1 = scmp.ne.s32.totalorder %s19_s21, %s321_s8  ;;  %p327_p3 = scmp.lt.s32.totalorder %s321_s8, %s321_s8 }
  0x21   :  { %p328_p4 = por %p327_p3, %p326_p2 }
  0x23   :  { %p329_p5 = pnand %p328_p4, %p322_p1 }
  0x25   :  { %332 = shalt.err (!%p329_p5)
}
  0x26   :  { %s412_s9 = smov 128   ;;  %s413_s10 = smov 8  }
  0x27   :  { %24 = dma.hbm_to_vmem [thread:$0]  %s532_s0, 256, %s19_s21, [#allocation3], %s412_s9, %s412_s9, %s413_s10  }
  0x28   :  { %s414_s13 = smov [#allocation7]   ;;  %s470_s17 = scalar_lea.hbm %s535_s3, 128 }
  0x29   :  { %s46_s14 = sshll.u32 %s414_s13, 4  ;;  %s333_s20 = scalar_lea.hbm %s534_s2, 256  ;;  %s47_s14 = int_to_ptr.vmem [resolvable:$true] %s46_s14 }
  0x2a   :  { %p334_p6 = scmp.ne.s32.totalorder %s534_s2, %s333_s20  ;;  %p337_p7 = scmp.lt.u32.totalorder %s333_s20, %s534_s2 }
  0x2c   :  { %p339_p8 = pnand %p337_p7, %p334_p6 }
  0x2e   :  { %342 = shalt.err (!%p339_p8)
}
  0x2f   :  { %s343_s0 = scalar_lea.vmem %s47_s14, 256  ;;  %p348_p10 = scmp.lt.s32.totalorder %s47_s14, %s47_s14 }
  0x30   :  { %p344_p9 = scmp.ne.s32.totalorder %s47_s14, %s343_s0  ;;  %p349_p11 = scmp.lt.s32.totalorder %s343_s0, %s343_s0 }
  0x32   :  { %p350_p12 = por %p349_p11, %p348_p10 }
  0x34   :  { %p351_p13 = pnand %p350_p12, %p344_p9 }
  0x36   :  { %354 = shalt.err (!%p351_p13)
}
  0x37   :  { %52 = dma.hbm_to_vmem [thread:$0]  %s534_s2, 256, %s47_s14, [#allocation6], %s412_s9, %s412_s9, %s413_s10  }
  0x38   :  { %s415_s27 = smov [#allocation8]   ;;  %s379_s1 = scalar_lea.hbm %s535_s3, 256 }
  0x39   :  { %s65_s28 = sshll.u32 %s415_s27, 4  ;;  %p356_p0 = scmp.ne.s32.totalorder %s470_s17, %s379_s1  ;;  %s66_s28 = int_to_ptr.vmem [resolvable:$true] %s65_s28 }
  0x3a   :  { %p358_p1 = scmp.lt.u32.totalorder %s470_s17, %s535_s3  ;;  %p359_p2 = scmp.lt.u32.totalorder %s379_s1, %s379_s1 }
  0x3b   :  { %p361_p4 = scmp.lt.u32.totalorder %s379_s1, %s470_s17 }
  0x3c   :  { %p360_p3 = por %p359_p2, %p358_p1 }
  0x3e   :  { %p362_p5 = por %p361_p4, %p360_p3 }
  0x40   :  { %p363_p6 = pnand %p362_p5, %p356_p0 }
  0x42   :  { %366 = shalt.err (!%p363_p6)
}
  0x43   :  { %s367_s7 = scalar_lea.vmem %s66_s28, 128  ;;  %p372_p8 = scmp.lt.s32.totalorder %s66_s28, %s66_s28 }
  0x44   :  { %p368_p7 = scmp.ne.s32.totalorder %s66_s28, %s367_s7  ;;  %p373_p9 = scmp.lt.s32.totalorder %s367_s7, %s367_s7 }
  0x46   :  { %p374_p10 = por %p373_p9, %p372_p8 }
  0x48   :  { %p375_p11 = pnand %p374_p10, %p368_p7 }
  0x4a   :  { %378 = shalt.err (!%p375_p11)
}
  0x4b   :  { %68 = dma.hbm_to_vmem [thread:$0]  %s470_s17, 128, %s66_s28, [#allocation9]  }
  0x4c   :  { %402 = dma.done.wait [#allocation3], 256  }
  0x4d   :  { %403 = vsyncadd [#allocation3], 4294967040 }
  0x4e   :  { %404 = dma.done.wait [#allocation6], 384  }
  0x4f   :  { %405 = vsyncadd [#allocation6], 4294966912 }
  0x50   :  { %406 = dma.done.wait [#allocation9], 128  }
  0x51   :  { %407 = vsyncadd [#allocation9], 4294967168  ;;  %v92_v0 = vld [vmem:[#allocation2] sm:$0xff]  ;;  %v94_v1 = vld [vmem:[#allocation7] sm:$0xff]  ;;  %s416_s2 = smov 112   ;;  %v101_v9 = vlaneseq  ;;  %s417_s3 = smov [#allocation10]  }
  0x52   :  { %v93_v2 = vld [vmem:[#allocation2 + $0x8] sm:$0xff]  ;;  %v96_v3 = vsub.f32 %v92_v0, %v94_v1  ;;  %v95_v4 = vld [vmem:[#allocation7 + $0x8] sm:$0xff]  ;;  %v98_v5 = vld [vmem:[#allocation5] sm:$0xff]  ;;  %s259_s8 = sshll.u32 %s417_s3, 4  ;;  %s260_s8 = int_to_ptr.vmem [resolvable:$true] %s259_s8 }
  0x53   :  { %v99_v6 = vld [vmem:[#allocation8] sm:$0xff]  ;;  %v97_v7 = vsub.f32 %v93_v2, %v95_v4  ;;  %v116_v10 = vshrl.u32 %v101_v9, 7  ;;  %v102_v14 = vand.u32 127, %v101_v9  ;;  %s380_s11 = scalar_lea.vmem %s260_s8, 256  ;;  %p385_p13 = scmp.lt.s32.totalorder %s260_s8, %s260_s8 }
  0x54   :  { %109 = vrot.lane.b32.xlu0 %v96_v3, %s416_s2  ;;  %v100_v8 = vsub.f32 %v98_v5, %v99_v6  ;;  %p381_p12 = scmp.ne.s32.totalorder %s260_s8, %s380_s11  ;;  %p386_p0 = scmp.lt.s32.totalorder %s380_s11, %s380_s11 }
  0x55   :  { %202 = vrot.lane.b32.xlu1 %v97_v7, %s416_s2  ;;  %v195_v11 = vmul.u32 128, %v116_v10  ;;  %vm117_vm0 = vcmp.lt.s32.totalorder %v116_v10, 7  ;;  %vm103_vm1 = vcmp.ge.s32.totalorder %v102_v14, 112 }
  0x56   :  { %p387_p1 = por %p386_p0, %p385_p13 }
  0x57   :  { %v198_v15 = vadd.s32 1024, %v195_v11 }
  0x58   :  { %111 = vrot.lane.b32.xlu0 %v97_v7, %s416_s2  ;;  %p388_p2 = pnand %p387_p1, %p381_p12 }
  0x59   :  { %204 = vrot.lane.b32.xlu1 %v100_v8, %s416_s2  ;;  %v200_v24 = vadd.s32 %v198_v15, %v102_v14 }
  0x5b   :  { %vm217_vm2 = vcmp.lt.s32.totalorder %v200_v24, 2032  ;;  %vm241_vm3 = vcmp.lt.s32.totalorder %v200_v24, 2016 }
  0xc6   :  { %v110_v12 = vpop.permute.xlu0 %109 }
  0xc7   :  { %v203_v13 = vpop.permute.xlu1 %202  ;;  %v113_v18 = vrot.slane %v110_v12, 1 }
  0xc8   :  { %v206_v16 = vrot.slane %v203_v13, 1 }
  0xca   :  { %v112_v17 = vpop.permute.xlu0 %111 }
  0xcb   :  { %v114_v19 = vrot.slane %v112_v17, 1  ;;  %v205_v20 = vpop.permute.xlu1 %204 }
  0xcc   :  { %v207_v21 = vrot.slane %v205_v20, 1 }
  0xcd   :  { %v118_v22 = vsel %vm117_vm0, %v113_v18, %v114_v19  ;;  %v119_v23 = vsel %vm117_vm0, %v114_v19, %v113_v18 }
  0xce   :  { %v121_v25 = vsel %vm103_vm1, %v119_v23, %v112_v17  ;;  %v209_v26 = vsel %vm117_vm0, %v206_v16, %v207_v21  ;;  %v210_v27 = vsel %vm117_vm0, %v207_v21, %v206_v16  ;;  %v120_v28 = vsel %vm103_vm1, %v118_v22, %v110_v12 }
  0xcf   :  { %v123_v29 = vsub.f32 %v121_v25, %v97_v7  ;;  %v122_v30 = vsub.f32 %v120_v28, %v96_v3  ;;  %v211_v31 = vsel %vm103_vm1, %v209_v26, %v203_v13  ;;  %v212_v32 = vsel %vm103_vm1, %v210_v27, %v205_v20 }
  0xd0   :  { %v213_v33 = vsub.f32 %v211_v31, %v97_v7  ;;  %v214_v36 = vsub.f32 %v212_v32, %v100_v8 }
  0xd1   :  { %131 = vrot.lane.b32.xlu1 %v123_v29, %s416_s2  ;;  %129 = vrot.lane.b32.xlu0 %v122_v30, %s416_s2  ;;  %v125_v34 = vmul.f32 %v122_v30, %v122_v30 }
  0xd2   :  { %v221_v35 = vmul.f32 %v213_v33, %v213_v33 }
  0xd4   :  { %v223_v37 = vsel %vm217_vm2, %v221_v35, 0.0 }
  0xd5   :  { %231 = vrot.lane.b32.xlu1 %v214_v36, %s416_s2  ;;  %229 = vrot.lane.b32.xlu0 %v213_v33, %s416_s2  ;;  %v227_v38 = vadd.f32 %v223_v37, %v125_v34 }
  0xd7   :  { %228 = vst [vmem:[#allocation10] sm:$0xff] %v227_v38 }
 0x143   :  { %v132_v39 = vpop.permute.xlu1 %131  ;;  %v130_v40 = vpop.permute.xlu0 %129 }
 0x144   :  { %v134_v41 = vrot.slane %v132_v39, 1  ;;  %v133_v42 = vrot.slane %v130_v40, 1 }
 0x146   :  { %v135_v43 = vsel %vm117_vm0, %v133_v42, %v134_v41 }
 0x147   :  { %v136_v44 = vsel %vm103_vm1, %v135_v43, %v130_v40  ;;  %v232_v45 = vpop.permute.xlu1 %231  ;;  %v230_v46 = vpop.permute.xlu0 %229 }
 0x148   :  { %v137_v47 = vsub.f32 %v136_v44, %v122_v30  ;;  %v234_v48 = vrot.slane %v232_v45, 1  ;;  %v233_v49 = vrot.slane %v230_v46, 1 }
 0x14a   :  { %v235_v50 = vsel %vm117_vm0, %v233_v49, %v234_v48  ;;  %v140_v51 = vmul.f32 %v137_v47, %v137_v47 }
 0x14b   :  { %v237_v52 = vsel %vm103_vm1, %v235_v50, %v230_v46 }
 0x14c   :  { %v239_v53 = vsub.f32 %v237_v52, %v213_v33 }
 0x14e   :  { %v245_v54 = vmul.f32 %v239_v53, %v239_v53 }
 0x150   :  { %v247_v55 = vsel %vm241_vm3, %v245_v54, 0.0 }
 0x151   :  { %v252_v56 = vadd.f32 %v247_v55, %v140_v51 }
 0x153   :  { %253 = vst [vmem:[#allocation10 + $0x8] sm:$0xff] %v252_v56 }
 0x154   :  { %391 = shalt.err (!%p388_p2)
}
 0x155   :  { %s392_s14 = scalar_lea.hbm %s536_s4, 256 }
 0x156   :  { %p393_p3 = scmp.ne.s32.totalorder %s536_s4, %s392_s14  ;;  %p396_p4 = scmp.lt.u32.totalorder %s392_s14, %s536_s4 }
 0x158   :  { %p398_p5 = pnand %p396_p4, %p393_p3 }
 0x15a   :  { %401 = shalt.err (!%p398_p5)
}
 0x15b   :  { %265 = dma.vmem_to_hbm [thread:$0]  %s260_s8, 256, %s536_s4, [#allocation4], %s412_s9, %s412_s9, %s413_s10  }
 0x15c   :  { %408 = dma.done.wait [#allocation4], 256  }
 0x15d   :  { %409 = vsyncadd [#allocation4], 4294967040 }
 0x15e   :  { %269 = vsyncpa [#allocation3], 1 }
 0x15f   :  { %270 = vsyncpa [#allocation6], 1 }
 0x160   :  { %271 = vsyncpa [#allocation9], 1 }
 0x161   :  { %272 = vsyncpa [#allocation4], 1 }

</bundles_post_ra>
